<compile_context>
chip_gen: v6e
topology: v6e:2x2x1
jax: 0.10.0
libtpu: 0.0.40
codegen_flags: <defaults>
</compile_context>

<pallas_src>
import math
import functools

import jax
import jax.numpy as jnp
from jax.experimental import pallas as pl
from jax.experimental.pallas import tpu as pltpu

LOG2E = math.log2(math.e)  # np.log2(np.exp(1))


def _gdc_kernel(B, data_dim, out_dim, hidden, unbiased,
                avg_ref, bb_ref,
                z_tr_ref, z_ev_ref, d_tr_ref, d_ev_ref,
                wz_ref, wy_ref, ba_ref, wb_ref,
                loss_ref, avg_out_ref):
    """Fused layers1 + layers2 forward and all reductions, entirely on VPU/XLU."""
    del hidden  # static; packed into the weight shapes already

    wz = wz_ref[...]          # (data_dim, 2H)  [w1a_z | 0]
    wy = wy_ref[...]          # (out_dim, 2H)   [w1a_y | w2a]
    ba = ba_ref[...]          # (1, 2H)         [b1a | b2a]
    wb = wb_ref[...]          # (2, 2H)         row0=[w1b|0], row1=[0|w2b]
    wb1 = wb[0:1, :]
    wb2 = wb[1:2, :]

    def hidden_act(z, d):
        # relu(z @ Wz + d @ Wy + ba); contraction unrolled on the VPU since
        # data_dim / out_dim are tiny for this model.
        h = ba
        for k in range(data_dim):
            h = h + z[:, k:k + 1] * wz[k:k + 1, :]
        for k in range(out_dim):
            h = h + d[:, k:k + 1] * wy[k:k + 1, :]
        return jnp.maximum(h, 0.0)                       # (B, 2H)

    h_tr = hidden_act(z_tr_ref[...], d_tr_ref[...])      # training rows
    h_ev = hidden_act(z_ev_ref[...], d_ev_ref[...])      # eval rows

    b1b = bb_ref[0]
    b2b = bb_ref[1]
    inv_b = 1.0 / float(B)

    # Training rows: only the MEAN of the logits is needed and the head is
    # linear, so fold everything into one full-array reduction per net and
    # add the output bias afterwards.
    mean_xy = jnp.sum(h_tr * wb1) * inv_b + b1b          # mean(pred_xy)
    mean_xy_d = jnp.sum(h_tr * wb2) * inv_b + b2b        # mean(pred_xy_D)

    # Eval rows: need per-row logits before exp (exp only on real eval rows).
    l1_ev = jnp.sum(h_ev * wb1, axis=-1, keepdims=True) + b1b   # (B, 1)
    l2_ev = jnp.sum(h_ev * wb2, axis=-1, keepdims=True) + b2b
    mean_e_xy = jnp.sum(jnp.exp(l1_ev)) * inv_b          # mean(exp(pred_x_y))
    mean_e_xy_d = jnp.sum(jnp.exp(l2_ev)) * inv_b        # mean(exp(pred_x_y_D))

    avg_et = avg_ref[0]
    if unbiased:  # static Python branch, mirrors torch's `if unbiased_loss:`
        avg_new = 0.01 * avg_et + 0.99 * mean_e_xy
        loss1 = LOG2E * (mean_xy - (mean_e_xy / avg_new) * jnp.log(mean_e_xy))
        loss2 = LOG2E * (mean_xy_d - (mean_e_xy_d / avg_new) * jnp.log(mean_e_xy_d))
    else:
        avg_new = avg_et
        loss1 = LOG2E * (mean_xy - jnp.log(mean_e_xy))
        loss2 = LOG2E * (mean_xy_d - jnp.log(mean_e_xy_d))

    loss_ref[0, 0] = loss1 - loss2
    avg_out_ref[0, 0] = avg_new


def init_params(key, data_dim=1, out_dim=1, hidden_size=10):
    """Deterministic PyTorch-style uniform(-1/sqrt(fan_in), 1/sqrt(fan_in)) init.

    Weights are stored (in_features, out_features) so the forward is x @ W + b.
    """
    ks = jax.random.split(key, 8)

    def lin(kw, kb, fan_in, fan_out):
        bound = 1.0 / math.sqrt(fan_in)
        w = jax.random.uniform(kw, (fan_in, fan_out), jnp.float32, -bound, bound)
        b = jax.random.uniform(kb, (fan_out,), jnp.float32, -bound, bound)
        return w, b

    din1 = data_dim + out_dim
    w1a, b1a = lin(ks[0], ks[1], din1, hidden_size)
    w1b, b1b = lin(ks[2], ks[3], hidden_size, 1)
    w2a, b2a = lin(ks[4], ks[5], out_dim, hidden_size)
    w2b, b2b = lin(ks[6], ks[7], hidden_size, 1)
    return dict(w1a=w1a, b1a=b1a, w1b=w1b, b1b=b1b,
                w2a=w2a, b2a=b2a, w2b=w2b, b2b=b2b)


def prepare_params(params, data_dim=1):
    """Fuse both nets' weights into one packed set.  Call ONCE and reuse every step."""
    w1a, b1a = params['w1a'], params['b1a']   # (data_dim+out_dim, H), (H,)
    w1b, b1b = params['w1b'], params['b1b']   # (H, 1), (1,)
    w2a, b2a = params['w2a'], params['b2a']   # (out_dim, H), (H,)
    w2b, b2b = params['w2b'], params['b2b']   # (H, 1), (1,)
    H = w1a.shape[1]
    zH = jnp.zeros((H,), jnp.float32)

    wz = jnp.concatenate(
        [w1a[:data_dim, :], jnp.zeros((data_dim, H), jnp.float32)], axis=1)  # (data_dim, 2H)
    wy = jnp.concatenate([w1a[data_dim:, :], w2a], axis=1)                   # (out_dim, 2H)
    ba = jnp.concatenate([b1a, b2a])[None, :]                                # (1, 2H)
    wb = jnp.stack([jnp.concatenate([w1b[:, 0], zH]),
                    jnp.concatenate([zH, w2b[:, 0]])])                       # (2, 2H)
    bb = jnp.concatenate([b1b, b2b])                                         # (2,)
    return dict(wz=wz, wy=wy, ba=ba, wb=wb, bb=bb)


@functools.partial(jax.jit, static_argnames=("unbiased_loss",))
def gdcnet_forward(prepared, z_tr, z_eval, D_tr, D_eval, avg_et, unbiased_loss):
    """Forward pass: all real work happens in one grid-less Pallas call."""
    B, data_dim = z_tr.shape
    out_dim = D_tr.shape[1]
    hidden = prepared['ba'].shape[1] // 2

    avg = jnp.asarray(avg_et, jnp.float32).reshape(1)

    kernel = functools.partial(_gdc_kernel, B, data_dim, out_dim, hidden,
                               bool(unbiased_loss))
    vmem = pl.BlockSpec(memory_space=pltpu.MemorySpace.VMEM)
    smem = pl.BlockSpec(memory_space=pltpu.MemorySpace.SMEM)

    # TODO(synk): for very large B add a row-blocked grid with partial-sum
    # accumulation (and 'parallel' row axis for v7x's 2 TCs / 64 MiB VMEM);
    # at typical GDCNet batch sizes one full-array block is fine.
    loss, avg_new = pl.pallas_call(
        kernel,
        out_shape=(jax.ShapeDtypeStruct((1, 1), jnp.float32),
                   jax.ShapeDtypeStruct((1, 1), jnp.float32)),
        in_specs=[smem, smem] + [vmem] * 8,
        out_specs=(smem, smem),
    )(avg, prepared['bb'],
      z_tr.astype(jnp.float32), z_eval.astype(jnp.float32),
      D_tr.astype(jnp.float32), D_eval.astype(jnp.float32),
      prepared['wz'], prepared['wy'], prepared['ba'], prepared['wb'])
    return loss[0, 0], avg_new[0, 0]


def ref_forward(params, z_tr, z_eval, D_tr, D_eval, avg_et, unbiased_loss):
    """Pure-JAX reference mirroring the PyTorch forward."""
    B = z_tr.shape[0]
    tiled_x = jnp.concatenate([z_tr, z_eval], axis=0)
    concat_y = jnp.concatenate([D_tr, D_eval], axis=0)
    inputs = jnp.concatenate([tiled_x, concat_y], axis=1)
    h = jnp.maximum(inputs @ params['w1a'] + params['b1a'], 0.0)
    logits = h @ params['w1b'] + params['b1b']
    pred_xy, pred_x_y = logits[:B], logits[B:]
    h2 = jnp.maximum(concat_y @ params['w2a'] + params['b2a'], 0.0)
    logits_d = h2 @ params['w2b'] + params['b2b']
    pred_xy_d, pred_x_y_d = logits_d[:B], logits_d[B:]
    if unbiased_loss:
        avg_et = 0.01 * avg_et + 0.99 * jnp.mean(jnp.exp(pred_x_y))
        loss1 = LOG2E * (jnp.mean(pred_xy)
                         - jnp.mean(jnp.exp(pred_x_y) / avg_et) * jnp.log(jnp.mean(jnp.exp(pred_x_y))))
        loss2 = LOG2E * (jnp.mean(pred_xy_d)
                         - jnp.mean(jnp.exp(pred_x_y_d) / avg_et) * jnp.log(jnp.mean(jnp.exp(pred_x_y_d))))
    else:
        loss1 = LOG2E * (jnp.mean(pred_xy) - jnp.log(jnp.mean(jnp.exp(pred_x_y))))
        loss2 = LOG2E * (jnp.mean(pred_xy_d) - jnp.log(jnp.mean(jnp.exp(pred_x_y_d))))
    return loss1 - loss2, jnp.asarray(avg_et, jnp.float32)


if __name__ == "__main__":
    data_dim, out_dim, hidden_size, B = 1, 1, 10, 8

    key = jax.random.PRNGKey(0)
    kp, kz1, kz2, kd1, kd2 = jax.random.split(key, 5)
    params = init_params(kp, data_dim, out_dim, hidden_size)
    prepared = prepare_params(params, data_dim)   # one-time weight fusion/packing

    z_tr = jax.random.normal(kz1, (B, data_dim), jnp.float32)
    z_eval = jax.random.normal(kz2, (B, data_dim), jnp.float32)
    D_tr = jax.random.normal(kd1, (B, out_dim), jnp.float32)
    D_eval = jax.random.normal(kd2, (B, out_dim), jnp.float32)
    avg_et = jnp.float32(1.0)

    ok = True
    for unbiased in (False, True):
        loss, avg_new = gdcnet_forward(prepared, z_tr, z_eval, D_tr, D_eval,
                                       avg_et, unbiased_loss=unbiased)
        loss = jax.block_until_ready(loss)
        avg_new = jax.block_until_ready(avg_new)
        loss_ref, avg_ref = ref_forward(params, z_tr, z_eval, D_tr, D_eval,
                                        avg_et, unbiased)
        ok &= bool(jnp.allclose(loss, loss_ref, rtol=1e-4, atol=1e-5))
        ok &= bool(jnp.allclose(avg_new, avg_ref, rtol=1e-4, atol=1e-5))

    if ok:
        print("KERNEL_OK")
    else:
        print("KERNEL_MISMATCH")
</pallas_src>

<mosaic_0001>
module attributes {stable_mosaic.version = 11 : i64} {
  func.func @_gdc_kernel(%arg0: memref<1xf32, #tpu.memory_space<smem>>, %arg1: memref<2xf32, #tpu.memory_space<smem>>, %arg2: memref<8x1xf32, #tpu.memory_space<vmem>>, %arg3: memref<8x1xf32, #tpu.memory_space<vmem>>, %arg4: memref<8x1xf32, #tpu.memory_space<vmem>>, %arg5: memref<8x1xf32, #tpu.memory_space<vmem>>, %arg6: memref<1x20xf32, #tpu.memory_space<vmem>>, %arg7: memref<1x20xf32, #tpu.memory_space<vmem>>, %arg8: memref<1x20xf32, #tpu.memory_space<vmem>>, %arg9: memref<2x20xf32, #tpu.memory_space<vmem>>, %arg10: memref<1x1xf32, #tpu.memory_space<smem>>, %arg11: memref<1x1xf32, #tpu.memory_space<smem>>) attributes {dimension_semantics = [], scalar_prefetch = 0 : i64, scratch_operands = 0 : i64, tpu.core_type = #tpu.core_type<tc>} {
    %c0 = arith.constant 0 : index
    %c0_0 = arith.constant 0 : index
    %0 = vector.load %arg6[%c0, %c0_0] : memref<1x20xf32, #tpu.memory_space<vmem>>, vector<1x20xf32>
    %c0_1 = arith.constant 0 : index
    %c0_2 = arith.constant 0 : index
    %1 = vector.load %arg7[%c0_1, %c0_2] : memref<1x20xf32, #tpu.memory_space<vmem>>, vector<1x20xf32>
    %c0_3 = arith.constant 0 : index
    %c0_4 = arith.constant 0 : index
    %2 = vector.load %arg8[%c0_3, %c0_4] : memref<1x20xf32, #tpu.memory_space<vmem>>, vector<1x20xf32>
    %c0_5 = arith.constant 0 : index
    %c0_6 = arith.constant 0 : index
    %3 = vector.load %arg9[%c0_5, %c0_6] : memref<2x20xf32, #tpu.memory_space<vmem>>, vector<2x20xf32>
    %4 = vector.extract_strided_slice %3 {offsets = [0, 0], sizes = [1, 20], strides = [1, 1]} : vector<2x20xf32> to vector<1x20xf32>
    %5 = vector.extract_strided_slice %3 {offsets = [1, 0], sizes = [1, 20], strides = [1, 1]} : vector<2x20xf32> to vector<1x20xf32>
    %c0_7 = arith.constant 0 : index
    %c0_8 = arith.constant 0 : index
    %6 = vector.load %arg2[%c0_7, %c0_8] : memref<8x1xf32, #tpu.memory_space<vmem>>, vector<8x1xf32>
    %c0_9 = arith.constant 0 : index
    %c0_10 = arith.constant 0 : index
    %7 = vector.load %arg4[%c0_9, %c0_10] : memref<8x1xf32, #tpu.memory_space<vmem>>, vector<8x1xf32>
    %8 = vector.broadcast %6 : vector<8x1xf32> to vector<8x20xf32>
    %9 = vector.broadcast %0 : vector<1x20xf32> to vector<8x20xf32>
    %10 = arith.mulf %8, %9 : vector<8x20xf32>
    %11 = vector.broadcast %2 : vector<1x20xf32> to vector<8x20xf32>
    %12 = arith.addf %11, %10 : vector<8x20xf32>
    %13 = vector.broadcast %7 : vector<8x1xf32> to vector<8x20xf32>
    %14 = vector.broadcast %1 : vector<1x20xf32> to vector<8x20xf32>
    %15 = arith.mulf %13, %14 : vector<8x20xf32>
    %16 = arith.addf %12, %15 : vector<8x20xf32>
    %cst = arith.constant 0.000000e+00 : f32
    %17 = vector.broadcast %cst : f32 to vector<8x20xf32>
    %18 = arith.maximumf %16, %17 : vector<8x20xf32>
    %c0_11 = arith.constant 0 : index
    %c0_12 = arith.constant 0 : index
    %19 = vector.load %arg3[%c0_11, %c0_12] : memref<8x1xf32, #tpu.memory_space<vmem>>, vector<8x1xf32>
    %c0_13 = arith.constant 0 : index
    %c0_14 = arith.constant 0 : index
    %20 = vector.load %arg5[%c0_13, %c0_14] : memref<8x1xf32, #tpu.memory_space<vmem>>, vector<8x1xf32>
    %21 = vector.broadcast %19 : vector<8x1xf32> to vector<8x20xf32>
    %22 = vector.broadcast %0 : vector<1x20xf32> to vector<8x20xf32>
    %23 = arith.mulf %21, %22 : vector<8x20xf32>
    %24 = vector.broadcast %2 : vector<1x20xf32> to vector<8x20xf32>
    %25 = arith.addf %24, %23 : vector<8x20xf32>
    %26 = vector.broadcast %20 : vector<8x1xf32> to vector<8x20xf32>
    %27 = vector.broadcast %1 : vector<1x20xf32> to vector<8x20xf32>
    %28 = arith.mulf %26, %27 : vector<8x20xf32>
    %29 = arith.addf %25, %28 : vector<8x20xf32>
    %cst_15 = arith.constant 0.000000e+00 : f32
    %30 = vector.broadcast %cst_15 : f32 to vector<8x20xf32>
    %31 = arith.maximumf %29, %30 : vector<8x20xf32>
    %c0_16 = arith.constant 0 : index
    %32 = memref.load %arg1[%c0_16] : memref<2xf32, #tpu.memory_space<smem>>
    %c1 = arith.constant 1 : index
    %33 = memref.load %arg1[%c1] : memref<2xf32, #tpu.memory_space<smem>>
    %34 = vector.broadcast %4 : vector<1x20xf32> to vector<8x20xf32>
    %35 = arith.mulf %18, %34 : vector<8x20xf32>
    %36 = vector.shape_cast %35 : vector<8x20xf32> to vector<1x8x20xf32>
    %cst_17 = arith.constant dense<0.000000e+00> : vector<1xf32>
    %37 = vector.multi_reduction <add>, %36, %cst_17 [1, 2] : vector<1x8x20xf32> to vector<1xf32>
    %38 = vector.shape_cast %37 : vector<1xf32> to vector<1x1x1xf32>
    %39 = vector.extract %38[0, 0, 0] : f32 from vector<1x1x1xf32>
    %cst_18 = arith.constant 1.250000e-01 : f32
    %40 = arith.mulf %39, %cst_18 : f32
    %41 = arith.addf %40, %32 : f32
    %42 = vector.broadcast %5 : vector<1x20xf32> to vector<8x20xf32>
    %43 = arith.mulf %18, %42 : vector<8x20xf32>
    %44 = vector.shape_cast %43 : vector<8x20xf32> to vector<1x8x20xf32>
    %cst_19 = arith.constant dense<0.000000e+00> : vector<1xf32>
    %45 = vector.multi_reduction <add>, %44, %cst_19 [1, 2] : vector<1x8x20xf32> to vector<1xf32>
    %46 = vector.shape_cast %45 : vector<1xf32> to vector<1x1x1xf32>
    %47 = vector.extract %46[0, 0, 0] : f32 from vector<1x1x1xf32>
    %cst_20 = arith.constant 1.250000e-01 : f32
    %48 = arith.mulf %47, %cst_20 : f32
    %49 = arith.addf %48, %33 : f32
    %50 = vector.broadcast %4 : vector<1x20xf32> to vector<8x20xf32>
    %51 = arith.mulf %31, %50 : vector<8x20xf32>
    %cst_21 = arith.constant dense<0.000000e+00> : vector<8xf32>
    %52 = vector.multi_reduction <add>, %51, %cst_21 [1] : vector<8x20xf32> to vector<8xf32>
    %53 = vector.shape_cast %52 : vector<8xf32> to vector<8x1xf32>
    %54 = vector.broadcast %32 : f32 to vector<8x1xf32>
    %55 = arith.addf %53, %54 : vector<8x1xf32>
    %56 = vector.broadcast %5 : vector<1x20xf32> to vector<8x20xf32>
    %57 = arith.mulf %31, %56 : vector<8x20xf32>
    %cst_22 = arith.constant dense<0.000000e+00> : vector<8xf32>
    %58 = vector.multi_reduction <add>, %57, %cst_22 [1] : vector<8x20xf32> to vector<8xf32>
    %59 = vector.shape_cast %58 : vector<8xf32> to vector<8x1xf32>
    %60 = vector.broadcast %33 : f32 to vector<8x1xf32>
    %61 = arith.addf %59, %60 : vector<8x1xf32>
    %62 = math.exp %55 : vector<8x1xf32>
    %63 = vector.shape_cast %62 : vector<8x1xf32> to vector<1x8x1xf32>
    %cst_23 = arith.constant dense<0.000000e+00> : vector<1xf32>
    %64 = vector.multi_reduction <add>, %63, %cst_23 [1, 2] : vector<1x8x1xf32> to vector<1xf32>
    %65 = vector.shape_cast %64 : vector<1xf32> to vector<1x1x1xf32>
    %66 = vector.extract %65[0, 0, 0] : f32 from vector<1x1x1xf32>
    %cst_24 = arith.constant 1.250000e-01 : f32
    %67 = arith.mulf %66, %cst_24 : f32
    %68 = math.exp %61 : vector<8x1xf32>
    %69 = vector.shape_cast %68 : vector<8x1xf32> to vector<1x8x1xf32>
    %cst_25 = arith.constant dense<0.000000e+00> : vector<1xf32>
    %70 = vector.multi_reduction <add>, %69, %cst_25 [1, 2] : vector<1x8x1xf32> to vector<1xf32>
    %71 = vector.shape_cast %70 : vector<1xf32> to vector<1x1x1xf32>
    %72 = vector.extract %71[0, 0, 0] : f32 from vector<1x1x1xf32>
    %cst_26 = arith.constant 1.250000e-01 : f32
    %73 = arith.mulf %72, %cst_26 : f32
    %c0_27 = arith.constant 0 : index
    %74 = memref.load %arg0[%c0_27] : memref<1xf32, #tpu.memory_space<smem>>
    %75 = math.log %67 : f32
    %76 = arith.subf %41, %75 : f32
    %cst_28 = arith.constant 1.44269502 : f32
    %77 = arith.mulf %cst_28, %76 : f32
    %78 = math.log %73 : f32
    %79 = arith.subf %49, %78 : f32
    %cst_29 = arith.constant 1.44269502 : f32
    %80 = arith.mulf %cst_29, %79 : f32
    %81 = arith.subf %77, %80 : f32
    %c0_30 = arith.constant 0 : index
    %c0_31 = arith.constant 0 : index
    %82 = memref.load %arg10[%c0_30, %c0_31] : memref<1x1xf32, #tpu.memory_space<smem>>
    memref.store %81, %arg10[%c0_30, %c0_31] : memref<1x1xf32, #tpu.memory_space<smem>>
    %c0_32 = arith.constant 0 : index
    %c0_33 = arith.constant 0 : index
    %83 = memref.load %arg11[%c0_32, %c0_33] : memref<1x1xf32, #tpu.memory_space<smem>>
    memref.store %74, %arg11[%c0_32, %c0_33] : memref<1x1xf32, #tpu.memory_space<smem>>
    return
  }
}

</mosaic_0001>

<bundles_post_ra>
// kernel: gdcnet_forward.1
= control target key start
LH: loop header
LB: loop body
LE: loop exit
PB: predicated region body
PF: predicated region fallthrough
CT: control target
= control target key end

     0   :  { %18 = vsyncpa [#allocation5], 0  ;;  %s405_s0 = inlined_call_operand.<no memory space> [shape: f32[1], index: 0, kind: input, shape index: {}]   ;;  %s406_s1 = inlined_call_operand.vmem [shape: f32[2], index: 1, kind: input, shape index: {}]   ;;  %s407_s2 = inlined_call_operand.vmem [shape: f32[8,1], index: 2, kind: input, shape index: {}]   ;;  %s408_s3 = inlined_call_operand.vmem [shape: f32[8,1], index: 3, kind: input, shape index: {}]   ;;  %s409_s4 = inlined_call_operand.vmem [shape: f32[8,1], index: 4, kind: input, shape index: {}]   ;;  %s410_s5 = inlined_call_operand.vmem [shape: f32[8,1], index: 5, kind: input, shape index: {}]   ;;  %s411_s6 = inlined_call_operand.vmem [shape: f32[1,20], index: 6, kind: input, shape index: {}]   ;;  %s412_s7 = inlined_call_operand.vmem [shape: f32[1,20], index: 7, kind: input, shape index: {}]   ;;  %s413_s8 = inlined_call_operand.vmem [shape: f32[1,20], index: 8, kind: input, shape index: {}]   ;;  %s414_s9 = inlined_call_operand.vmem [shape: f32[2,20], index: 9, kind: input, shape index: {}]   ;;  %s415_s10 = inlined_call_operand.hbm [shape: f32[1,1], index: 10, kind: output, shape index: {0}]   ;;  %s416_s11 = inlined_call_operand.hbm [shape: f32[1,1], index: 11, kind: output, shape index: {1}]  }
   0x1   :  { %19 = vsyncpa [#allocation4], 0 }
   0x2   :  { %20 = vsyncpa [#allocation8], 0  ;;  %s29_s19 = sshll.u32 %s406_s1, 4  ;;  %s30_s19 = int_to_ptr.vmem [resolvable:$true] %s29_s19 }
   0x3   :  { %s259_s20 = scalar_lea.vmem %s30_s19, 16  ;;  %p264_p1 = scmp.lt.s32.totalorder %s30_s19, %s30_s19 }
   0x4   :  { %p260_p0 = scmp.ne.s32.totalorder %s30_s19, %s259_s20  ;;  %p265_p2 = scmp.lt.s32.totalorder %s259_s20, %s259_s20 }
   0x6   :  { %p266_p3 = por %p265_p2, %p264_p1 }
   0x8   :  { %p267_p4 = pnand %p266_p3, %p260_p0 }
   0xa   :  { %270 = shalt.err (!%p267_p4)
}
   0xb   :  { %s293_s21 = smov [#allocation3]  }
   0xc   :  { %32 = dma.vmem_to_smem %s30_s19, 16, %s293_s21, [#allocation5]  }
   0xd   :  { %287 = dma.done.wait [#allocation5], 16  }
   0xe   :  { %288 = vsyncadd [#allocation5], 4294967280 }
   0xf   :  { %52 = sfence }
  0x10   :  { %v92_v0 = vld [vmem:[%s408_s3] sm:$0xff]  ;;  %202 = sst [smem:[#allocation7]] %s405_s0  ;;  %v294_v1 = vmov 0   ;;  %v111_v4 = vlaneseq  ;;  %vm116_vm0 = vcmask 162816   ;;  %vm160_vm1 = vcmask 7168   ;;  %s296_s0 = smov [#allocation6]  }
  0x11   :  { %249 = vset.pattern.permute.xlu0 %v294_v1  ;;  %250 = vset.pattern.permute.xlu1 %v294_v1  ;;  %v93_v2 = vld [vmem:[%s410_s5] sm:$0xff] }
  0x12   :  { %96 = vperm.xlu0 %249, %v92_v0   ;;  %v57_v3 = vld [vmem:[%s407_s2] sm:$0xff]  ;;  %v112_v6 = vshrl.u32 %v111_v4, 7 }
  0x13   :  { %v229_v5 = vld [vmem:[%s411_s6] ss:$0 sm:$0xff] }
  0x14   :  { %v230_v9 = vld [vmem:[%s413_s8] ss:$0 sm:$0xff]  ;;  %v113_v11 = vsub.s32 0, %v112_v6  ;;  %v131_v16 = vsub.s32 1, %v112_v6  ;;  %s389_s8 = sld [smem:[#allocation3]] }
  0x15   :  { %v231_v10 = vld [vmem:[%s412_s7] ss:$0 sm:$0xff] }
  0x16   :  { %103 = vperm.xlu0 %249, %v93_v2   ;;  %v56_v13 = vld [vmem:[%s414_s9] sm:$0x3]  ;;  %s391_s9 = sld [smem:[#allocation3 + $0x1]] }
  0x17   :  { %v114_v18 = vrot.slane %v56_v13, %v113_v11  ;;  %v132_v22 = vrot.slane %v56_v13, %v131_v16  ;;  %v58_v28 = vld [vmem:[%s409_s4] sm:$0xff]  ;;  %s295_s4 = smov [#allocation7]  }
  0x18   :  { %218 = dma.smem_to_hbm %s295_s4, 16, %s416_s11, [#allocation8]  }
  0x1a   :  { %61 = vperm.xlu0 %249, %v57_v3   ;;  %v150_v29 = vstv %s389_s8 }
  0x1c   :  { %v156_v32 = vstv %s391_s9 }
  0x8d   :  { %v97_v7 = vpop.permute.xlu0 %96 }
  0x8e   :  { %v99_v8 = vmul.f32 %v229_v5, %v97_v7 }
  0x90   :  { %v100_v14 = vadd.f32 %v230_v9, %v99_v8 }
  0x91   :  { %v104_v12 = vpop.permute.xlu0 %103 }
  0x92   :  { %v106_v15 = vmul.f32 %v231_v10, %v104_v12 }
  0x94   :  { %v107_v17 = vadd.f32 %v106_v15, %v100_v14 }
  0x95   :  { %v62_v19 = vpop.permute.xlu0 %61 }
  0x96   :  { %v108_v20 = vmax.f32 %v107_v17, 0.0  ;;  %v70_v21 = vmul.f32 %v229_v5, %v62_v19 }
  0x98   :  { %v77_v23 = vadd.f32 %v230_v9, %v70_v21  ;;  %v146_v24 = vmul.f32 %v114_v18, %v108_v20  ;;  %v152_v26 = vmul.f32 %v132_v22, %v108_v20 }
  0x9a   :  { %v147_v25 = vsel %vm116_vm0, %v146_v24, 0.0  ;;  %v153_v27 = vsel %vm116_vm0, %v152_v26, 0.0 }
  0x9b   :  { %148 = vadd.xlane.f32.xlu1 %v147_v25 }
  0x9f   :  { %154 = vadd.xlane.f32.xlu1 %v153_v27 }
  0xb0   :  { %80 = vperm.xlu1 %250, %v58_v28  }
 0x124   :  { %v149_v30 = vpop.xlane.xlu1 %148 }
 0x125   :  { %v151_v31 = vadd.f32 %v150_v29, %v149_v30 }
 0x127   :  { %v158_v33 = vmul.f32 1.442695, %v151_v31 }
 0x128   :  { %v155_v34 = vpop.xlane.xlu1 %154 }
 0x129   :  { %251 = vpow2.f32 %v158_v33  ;;  %v157_v35 = vadd.f32 %v156_v32, %v155_v34 }
 0x12b   :  { %v172_v36 = vmul.f32 1.442695, %v157_v35 }
 0x12c   :  { %v81_v37 = vpop.permute.xlu1 %80 }
 0x12d   :  { %253 = vpow2.f32 %v172_v36  ;;  %v89_v38 = vmul.f32 %v231_v10, %v81_v37 }
 0x12f   :  { %v90_v39 = vadd.f32 %v89_v38, %v77_v23 }
 0x131   :  { %v91_v40 = vmax.f32 %v90_v39, 0.0 }
 0x133   :  { %v133_v41 = vmul.f32 %v132_v22, %v91_v40  ;;  %v115_v42 = vmul.f32 %v114_v18, %v91_v40 }
 0x135   :  { %v134_v43 = vsel %vm116_vm0, %v133_v41, 0.0  ;;  %v117_v44 = vsel %vm116_vm0, %v115_v42, 0.0 }
 0x136   :  { %v252_v45 = vpop.eup %251  ;;  %135 = vadd.xlane.f32.xlu1 %v134_v43  ;;  %118 = vadd.xlane.f32.xlu0 %v117_v44 }
 0x137   :  { %v161_v46 = vsel %vm160_vm1, %v252_v45, 0.0 }
 0x13a   :  { %v254_v47 = vpop.eup %253  ;;  %162 = vadd.xlane.f32.xlu0 %v161_v46 }
 0x13b   :  { %v174_v48 = vsel %vm160_vm1, %v254_v47, 0.0 }
 0x13e   :  { %175 = vadd.xlane.f32.xlu0 %v174_v48 }
 0x1bf   :  { %v136_v49 = vpop.xlane.xlu1 %135  ;;  %v119_v50 = vpop.xlane.xlu0 %118 }
 0x1c0   :  { %v137_v51 = vrot.slane %v136_v49, 4  ;;  %v120_v52 = vrot.slane %v119_v50, 4 }
 0x1c2   :  { %v138_v53 = vadd.f32 %v137_v51, %v136_v49  ;;  %v121_v54 = vadd.f32 %v120_v52, %v119_v50 }
 0x1c3   :  { %v163_v55 = vpop.xlane.xlu0 %162 }
 0x1c4   :  { %v139_v56 = vrot.slane %v138_v53, 2  ;;  %v122_v57 = vrot.slane %v121_v54, 2  ;;  %v164_v58 = vrot.slane %v163_v55, 4 }
 0x1c6   :  { %v140_v59 = vadd.f32 %v139_v56, %v138_v53  ;;  %v165_v60 = vadd.f32 %v164_v58, %v163_v55  ;;  %v123_v61 = vadd.f32 %v122_v57, %v121_v54 }
 0x1c7   :  { %v176_v62 = vpop.xlane.xlu0 %175 }
 0x1c8   :  { %v166_v63 = vrot.slane %v165_v60, 2  ;;  %v177_v0 = vrot.slane %v176_v62, 4  ;;  %v124_v1 = vrot.slane %v123_v61, 1  ;;  %v141_v2 = vrot.slane %v140_v59, 1 }
 0x1ca   :  { %v178_v3 = vadd.f32 %v177_v0, %v176_v62  ;;  %v125_v4 = vadd.f32 %v124_v1, %v123_v61  ;;  %v142_v5 = vadd.f32 %v141_v2, %v140_v59  ;;  %v167_v6 = vadd.f32 %v166_v63, %v165_v60 }
 0x1cc   :  { %v179_v7 = vrot.slane %v178_v3, 2  ;;  %233 = vpush %v125_v4  ;;  %v168_v8 = vrot.slane %v167_v6, 1 }
 0x1cd   :  { %235 = vpush %v142_v5 }
 0x1ce   :  { %v180_v9 = vadd.f32 %v179_v7, %v178_v3  ;;  %v169_v10 = vadd.f32 %v168_v8, %v167_v6 }
 0x1d0   :  { %237 = vpush %v169_v10  ;;  %v181_v11 = vrot.slane %v180_v9, 1 }
 0x1d2   :  { %v182_v12 = vadd.f32 %v181_v11, %v180_v9 }
 0x1d4   :  { %239 = vpush %v182_v12 }
 0x1fd   :  { %s234_s16 = spop %233 }
 0x1fe   :  { %s236_s17 = spop %235  ;;  %s127_s11 = smul.f32 0.125, %s234_s16 }
 0x1ff   :  { %s144_s22 = smul.f32 0.125, %s236_s17 }
 0x200   :  { %s128_s23 = sadd.f32 %s127_s11, %s389_s8 }
 0x201   :  { %s238_s18 = spop %237  ;;  %s145_s1 = sadd.f32 %s391_s9, %s144_s22 }
 0x202   :  { %s171_s19 = smul.f32 0.125, %s238_s18 }
 0x204   :  { %v186_v13 = vstv %s171_s19 }
 0x205   :  { %255 = vlog2.f32 %v186_v13  ;;  %s240_s20 = spop %239 }
 0x206   :  { %s184_s21 = smul.f32 0.125, %s240_s20 }
 0x208   :  { %v192_v14 = vstv %s184_s21 }
 0x209   :  { %257 = vlog2.f32 %v192_v14 }
 0x212   :  { %v256_v15 = vpop.eup %255 }
 0x213   :  { %v188_v16 = vmul.f32 0.6931472, %v256_v15 }
 0x215   :  { %241 = vpush %v188_v16 }
 0x216   :  { %v258_v17 = vpop.eup %257 }
 0x217   :  { %v194_v18 = vmul.f32 0.6931472, %v258_v17 }
 0x219   :  { %243 = vpush %v194_v18 }
 0x246   :  { %s242_s24 = spop %241 }
 0x247   :  { %s190_s25 = ssub.f32 %s128_s23, %s242_s24 }
 0x249   :  { %s191_s28 = smul.f32 1.442695, %s190_s25 }
 0x24a   :  { %s244_s26 = spop %243 }
 0x24b   :  { %s196_s27 = ssub.f32 %s145_s1, %s244_s26 }
 0x24d   :  { %s197_s3 = smul.f32 1.442695, %s196_s27 }
 0x24f   :  { %s198_s29 = ssub.f32 %s191_s28, %s197_s3 }
 0x251   :  { %200 = sst [smem:[#allocation6]] %s198_s29 }
 0x252   :  { %210 = dma.smem_to_hbm %s296_s0, 16, %s415_s10, [#allocation4]  }
 0x253   :  { %289 = dma.done.wait [#allocation4], 16  }
 0x254   :  { %290 = vsyncadd [#allocation4], 4294967280 }
 0x255   :  { %291 = dma.done.wait [#allocation8], 16  }
 0x256   :  { %292 = vsyncadd [#allocation8], 4294967280 }
 0x257   :  { %225 = sfence }
 0x258   :  { %226 = vsyncpa [#allocation4], 1 }
 0x259   :  { %227 = vsyncpa [#allocation8], 1 }
 0x25a   :  { %228 = vsyncpa [#allocation5], 1 }

</bundles_post_ra>
